<compile_context>
chip_gen: v7x
topology: tpu7x:2x2x1
jax: 0.10.0
libtpu: 0.0.40
codegen_flags: <defaults>
</compile_context>

<pallas_src>
import functools
import math

import jax
import jax.numpy as jnp
from jax.experimental import pallas as pl
from jax.experimental.pallas import tpu as pltpu


# ---------------------------------------------------------------------------
# helpers
# ---------------------------------------------------------------------------
def _sublane_quantum(dtype) -> int:
    """Minimum second-minor block granularity for this dtype (8 f32 / 16 bf16 / 32 int8)."""
    return max(8, 32 // jnp.dtype(dtype).itemsize)


def _pick_tile(total: int, cap: int, quantum: int, *, min_steps: int = 1) -> int:
    """Largest multiple-of-`quantum` divisor of `total` that is <= cap, preferring at least
    `min_steps` grid steps (v7x megacore). Falls back to the full extent (always layout-legal)."""
    cap = min(cap, total)
    cands = [t for t in range(quantum, cap + 1, quantum) if total % t == 0]
    good = [t for t in cands if total // t >= min_steps]
    if good:
        return max(good)
    if cands:
        return max(cands)
    # TODO(synk): pad-or-mask the ragged tail instead of falling back to one full-extent block.
    return total


@functools.cache
def _single_buffer_consts_supported() -> bool:
    """True if this Pallas build accepts pipeline_mode=pl.Buffered(1).

    Probed by construction + lowering/compilation only (never executed), so it is safe to call
    under an outer jit trace and cannot cache a spurious False."""
    try:
        spec = pl.BlockSpec((8, 128), lambda i: (0, 0), pipeline_mode=pl.Buffered(1))

        def _copy(x_ref, o_ref):
            o_ref[...] = x_ref[...]

        fn = pl.pallas_call(
            _copy,
            out_shape=jax.ShapeDtypeStruct((8, 128), jnp.float32),
            grid=(1,),
            in_specs=[spec],
            out_specs=pl.BlockSpec((8, 128), lambda i: (0, 0)),
        )
        jax.jit(fn).lower(jax.ShapeDtypeStruct((8, 128), jnp.float32)).compile()
        return True
    except Exception:  # older Pallas builds: fall back to default double-buffering
        return False


def _const_spec(shape):
    """BlockSpec for an operand whose block index never changes across the grid
    (resident weights / LN params): single-buffered when the build supports it."""
    ndim = len(shape)
    index_map = lambda *_: (0,) * ndim
    if _single_buffer_consts_supported():
        return pl.BlockSpec(shape, index_map, pipeline_mode=pl.Buffered(1))
    return pl.BlockSpec(shape, index_map)


def _compiler_params(dimension_semantics, vmem_limit_bytes):
    return pltpu.CompilerParams(
        dimension_semantics=dimension_semantics,
        vmem_limit_bytes=vmem_limit_bytes,
    )


def _cost(flops, bytes_accessed, transcendentals=0):
    return pl.CostEstimate(flops=int(flops), transcendentals=int(transcendentals),
                           bytes_accessed=int(bytes_accessed))


# ---------------------------------------------------------------------------
# kernel bodies
# ---------------------------------------------------------------------------
def _embed_pe_kernel(emb_ref, pe_ref, o_ref, *, scale):
    # emb_ref: (S, d_model) gathered embedding rows for one batch; pe_ref: (S, d_model).
    y = emb_ref[...].astype(jnp.float32) * scale + pe_ref[...].astype(jnp.float32)
    o_ref[...] = y.astype(o_ref.dtype)


def _qkv_proj_kernel(x_ref, w_ref, o_ref):
    # One (row-tile, weight-column-tile) block of the fused [q|k|v] projection.
    o_ref[...] = jnp.dot(x_ref[...], w_ref[...],
                         preferred_element_type=jnp.float32).astype(o_ref.dtype)


def _attention_kernel(q_ref, k_ref, v_ref, o_ref):
    # One (batch, head, q-tile) per grid step.  1/sqrt(d_model) is folded into Wq at prep time.
    # TODO(synk): src_mask (masked_fill) and returning attention probabilities are not
    #             implemented; the Encoder demo runs the mask=None, return_attn=False path.
    s = jax.lax.dot_general(q_ref[...], k_ref[...], (((1,), (1,)), ((), ())),
                            preferred_element_type=jnp.float32)          # (tq, S)
    m = jnp.max(s, axis=-1, keepdims=True)
    p = jnp.exp(s - m)
    l = jnp.sum(p, axis=-1, keepdims=True)
    o = jnp.dot(p.astype(v_ref.dtype), v_ref[...], preferred_element_type=jnp.float32)
    o_ref[...] = (o * pl.reciprocal(l, approx=True)).astype(o_ref.dtype)


def _proj_residual_ln_kernel(a_ref, res_ref, w_ref, gamma_ref, beta_ref, o_ref):
    # y = LayerNorm(a @ Wo + residual), eps = 1e-6 (dropout identity at inference).
    y = jnp.dot(a_ref[...], w_ref[...], preferred_element_type=jnp.float32)
    y = y + res_ref[...].astype(jnp.float32)
    mean = jnp.mean(y, axis=-1, keepdims=True)
    var = jnp.mean(jnp.square(y - mean), axis=-1, keepdims=True)
    y = (y - mean) * jax.lax.rsqrt(var + 1e-6)
    y = y * gamma_ref[...].astype(jnp.float32) + beta_ref[...].astype(jnp.float32)
    o_ref[...] = y.astype(o_ref.dtype)


def _ffn_kernel(x_ref, w1_ref, b1_ref, w2_ref, b2_ref, gamma_ref, beta_ref, o_ref, acc_ref):
    # y = LayerNorm(relu(x@W1+b1)@W2 + b2 + x), with the d_inner axis streamed over grid axis 1.
    k = pl.program_id(1)

    @pl.when(k == 0)
    def _():
        acc_ref[...] = jnp.zeros_like(acc_ref)

    x = x_ref[...]
    h = jnp.dot(x, w1_ref[...], preferred_element_type=jnp.float32)
    h = jnp.maximum(h + b1_ref[...].astype(jnp.float32), 0.0)
    acc_ref[...] += jnp.dot(h.astype(w2_ref.dtype), w2_ref[...],
                            preferred_element_type=jnp.float32)

    @pl.when(k == pl.num_programs(1) - 1)
    def _():
        y = acc_ref[...] + b2_ref[...].astype(jnp.float32) + x.astype(jnp.float32)
        mean = jnp.mean(y, axis=-1, keepdims=True)
        var = jnp.mean(jnp.square(y - mean), axis=-1, keepdims=True)
        y = (y - mean) * jax.lax.rsqrt(var + 1e-6)
        y = y * gamma_ref[...].astype(jnp.float32) + beta_ref[...].astype(jnp.float32)
        o_ref[...] = y.astype(o_ref.dtype)


# ---------------------------------------------------------------------------
# wrappers
# ---------------------------------------------------------------------------
def embed_with_pe(src_seq, emb_table, pe_table, *, vmem_limit_bytes=None):
    """Embedding lookup * sqrt(d_model) + positional encoding (dropout = identity)."""
    B, S = src_seq.shape
    d_model = emb_table.shape[1]
    rows = B * S
    assert pe_table.shape[0] >= S
    # Gather in plain XLA (one fused gather beats a one-row-per-step Pallas grid), then do
    # the scale + PE add in a sublane/lane-dense Pallas kernel (one (S, d_model) block per batch).
    emb_rows = emb_table[src_seq.astype(jnp.int32)].reshape(rows, d_model)
    itemsize = jnp.dtype(emb_table.dtype).itemsize

    return pl.pallas_call(
        functools.partial(_embed_pe_kernel, scale=math.sqrt(d_model)),
        out_shape=jax.ShapeDtypeStruct((rows, d_model), emb_table.dtype),
        grid=(B,),
        in_specs=[
            pl.BlockSpec((S, d_model), lambda b: (b, 0)),
            _const_spec((S, d_model)),                      # PE rows 0..S-1, fetched once
        ],
        out_specs=pl.BlockSpec((S, d_model), lambda b: (b, 0)),
        compiler_params=_compiler_params(("parallel",), vmem_limit_bytes),
        cost_estimate=_cost(2 * rows * d_model,
                            itemsize * (2 * rows * d_model + S * d_model)),
    )(emb_rows, pe_table)


def multi_head_attention(x2d, wqkv, wo, gamma, beta, *, B, S, n_head,
                         row_tile=512, q_tile=256, col_tile=1536, vmem_limit_bytes=None):
    """MultiHeadAttention forward (mask=None, eval mode); d_k = d_v = d_model (module wiring).

    x2d is (B*S, d_model); heads are addressed as column blocks of the fused qkv output, so no
    XLA head-split / concat transposes are needed."""
    rows, d_model = x2d.shape
    assert rows == B * S
    dproj = n_head * d_model
    assert wqkv.shape == (d_model, 3 * dproj)
    itemsize = jnp.dtype(x2d.dtype).itemsize
    quantum = _sublane_quantum(x2d.dtype)
    tile = _pick_tile(rows, row_tile, quantum, min_steps=2)
    nct = _pick_tile(3 * dproj, col_tile, 128)              # streamed weight-column tile

    # --- fused [q|k|v] projection: one MXU stream, weight columns streamed over grid axis 1 ----
    qkv2d = pl.pallas_call(
        _qkv_proj_kernel,
        out_shape=jax.ShapeDtypeStruct((rows, 3 * dproj), x2d.dtype),
        grid=(rows // tile, (3 * dproj) // nct),
        in_specs=[
            pl.BlockSpec((tile, d_model), lambda i, j: (i, 0)),
            pl.BlockSpec((d_model, nct), lambda i, j: (0, j)),
        ],
        out_specs=pl.BlockSpec((tile, nct), lambda i, j: (i, j)),
        compiler_params=_compiler_params(("parallel", "parallel"), vmem_limit_bytes),
        cost_estimate=_cost(2 * rows * d_model * 3 * dproj,
                            itemsize * (rows * d_model + d_model * 3 * dproj + rows * 3 * dproj)),
    )(x2d, wqkv)

    # --- scaled dot-product attention: grid (batch, head, q-tile); q/k/v addressed as
    #     (row-block, column-block) windows of the single fused qkv tensor -----------------------
    tq = _pick_tile(S, q_tile, quantum)
    nqt = S // tq
    attn2d = pl.pallas_call(
        _attention_kernel,
        out_shape=jax.ShapeDtypeStruct((rows, dproj), x2d.dtype),   # already in "concat" layout
        grid=(B, n_head, nqt),
        in_specs=[
            pl.BlockSpec((tq, d_model), lambda b, h, t: (b * nqt + t, h)),           # q
            pl.BlockSpec((S, d_model), lambda b, h, t: (b, n_head + h)),              # k
            pl.BlockSpec((S, d_model), lambda b, h, t: (b, 2 * n_head + h)),          # v
        ],
        out_specs=pl.BlockSpec((tq, d_model), lambda b, h, t: (b * nqt + t, h)),
        compiler_params=_compiler_params(("parallel", "parallel", "parallel"), vmem_limit_bytes),
        cost_estimate=_cost(4 * B * n_head * S * S * d_model,
                            itemsize * (rows * 3 * dproj + rows * dproj),
                            transcendentals=B * n_head * S * S),
    )(qkv2d, qkv2d, qkv2d)

    # --- output projection + residual + LayerNorm ----------------------------------------------
    out2d = pl.pallas_call(
        _proj_residual_ln_kernel,
        out_shape=jax.ShapeDtypeStruct((rows, d_model), x2d.dtype),
        grid=(rows // tile,),
        in_specs=[
            pl.BlockSpec((tile, dproj), lambda i: (i, 0)),
            pl.BlockSpec((tile, d_model), lambda i: (i, 0)),     # residual
            _const_spec((dproj, d_model)),
            _const_spec((1, d_model)),
            _const_spec((1, d_model)),
        ],
        out_specs=pl.BlockSpec((tile, d_model), lambda i: (i, 0)),
        compiler_params=_compiler_params(("parallel",), vmem_limit_bytes),
        cost_estimate=_cost(2 * rows * dproj * d_model,
                            itemsize * (rows * dproj + dproj * d_model + 2 * rows * d_model),
                            transcendentals=rows),
    )(attn2d, x2d, wo, gamma.reshape(1, -1), beta.reshape(1, -1))
    return out2d


def positionwise_feed_forward(x2d, w1, b1, w2, b2, gamma, beta, *,
                              row_tile=512, inner_tile=2048, vmem_limit_bytes=None):
    """Fused FFN: LayerNorm(fc2(relu(fc1(x))) + x); d_inner streamed on a reduction grid axis."""
    rows, d_model = x2d.shape
    d_inner = w1.shape[1]
    itemsize = jnp.dtype(x2d.dtype).itemsize
    quantum = _sublane_quantum(x2d.dtype)
    tile = _pick_tile(rows, row_tile, quantum, min_steps=2)
    kt = _pick_tile(d_inner, inner_tile, 128)
    nk = d_inner // kt

    return pl.pallas_call(
        _ffn_kernel,
        out_shape=jax.ShapeDtypeStruct((rows, d_model), x2d.dtype),
        grid=(rows // tile, nk),
        in_specs=[
            pl.BlockSpec((tile, d_model), lambda i, k: (i, 0)),   # x (also the residual)
            pl.BlockSpec((d_model, kt), lambda i, k: (0, k)),     # W1 column block
            pl.BlockSpec((1, kt), lambda i, k: (0, k)),           # b1 block
            pl.BlockSpec((kt, d_model), lambda i, k: (k, 0)),     # W2 row block
            _const_spec((1, d_model)),                            # b2
            _const_spec((1, d_model)),                            # gamma
            _const_spec((1, d_model)),                            # beta
        ],
        out_specs=pl.BlockSpec((tile, d_model), lambda i, k: (i, 0)),
        scratch_shapes=[pltpu.VMEM((tile, d_model), jnp.float32)],
        compiler_params=_compiler_params(("parallel", "arbitrary"), vmem_limit_bytes),
        cost_estimate=_cost(4 * rows * d_model * d_inner,
                            itemsize * (2 * rows * d_model + 2 * d_model * d_inner),
                            transcendentals=rows),
    )(x2d, w1, b1.reshape(1, -1), w2, b2.reshape(1, -1),
      gamma.reshape(1, -1), beta.reshape(1, -1))


def prepare_params(params, dtype=jnp.float32):
    """Parameter prep: fuse Wq|Wk|Wv, fold 1/sqrt(d_model) into Wq, cast everything to `dtype`."""
    d_model = params["emb"].shape[1]
    scale = 1.0 / math.sqrt(d_model)
    layers = []
    for layer in params["layers"]:
        wqkv = jnp.concatenate([layer["wq"] * scale, layer["wk"], layer["wv"]], axis=1)
        layers.append(dict(
            wqkv=wqkv.astype(dtype),
            wo=layer["wo"].astype(dtype),
            ln1_g=layer["ln1_g"].astype(dtype), ln1_b=layer["ln1_b"].astype(dtype),
            w1=layer["w1"].astype(dtype), b1=layer["b1"].astype(dtype),
            w2=layer["w2"].astype(dtype), b2=layer["b2"].astype(dtype),
            ln2_g=layer["ln2_g"].astype(dtype), ln2_b=layer["ln2_b"].astype(dtype),
        ))
    return dict(emb=params["emb"].astype(dtype), pe=params["pe"].astype(dtype),
                n_head=params["n_head"], layers=layers)


def encoder_forward(src_seq, prepared, *, row_tile=512, q_tile=256, qkv_col_tile=1536,
                    ffn_inner_tile=2048, vmem_limit_bytes=None):
    """Full Encoder forward (src_mask=None, return_attn=False, eval mode)."""
    B, S = src_seq.shape
    emb = prepared["emb"]
    d_model = emb.shape[1]
    n_head = prepared["n_head"]
    quantum = _sublane_quantum(emb.dtype)
    assert d_model % 128 == 0, "d_model must be a multiple of 128 (lane-dense head column blocks)"
    assert S % quantum == 0, f"seq len must be a multiple of {quantum} for {emb.dtype} activations"
    # TODO(synk): pad the sequence (and mask the padded keys) to lift the alignment requirements.

    x2d = embed_with_pe(src_seq, emb, prepared["pe"], vmem_limit_bytes=vmem_limit_bytes)
    for layer in prepared["layers"]:
        x2d = multi_head_attention(
            x2d, layer["wqkv"], layer["wo"], layer["ln1_g"], layer["ln1_b"],
            B=B, S=S, n_head=n_head, row_tile=row_tile, q_tile=q_tile,
            col_tile=qkv_col_tile, vmem_limit_bytes=vmem_limit_bytes)
        x2d = positionwise_feed_forward(
            x2d, layer["w1"], layer["b1"], layer["w2"], layer["b2"],
            layer["ln2_g"], layer["ln2_b"],
            row_tile=row_tile, inner_tile=ffn_inner_tile, vmem_limit_bytes=vmem_limit_bytes)
    # NOTE: Encoder.__init__ defines a trailing LayerNorm that Encoder.forward never applies.
    return x2d.reshape(B, S, d_model)


# ---------------------------------------------------------------------------
# pure-JAX reference (mirrors the PyTorch forward pass in eval mode)
# ---------------------------------------------------------------------------
def sinusoidal_pe(max_len, d_model):
    # Net effect of the PyTorch PE[pos:, ...] loop: row r ends up with the standard table.
    pos = jnp.arange(max_len, dtype=jnp.float32)[:, None]
    div = jnp.power(10000.0, jnp.arange(0, d_model, 2, dtype=jnp.float32) / d_model)
    pe = jnp.zeros((max_len, d_model), jnp.float32)
    pe = pe.at[:, 0::2].set(jnp.sin(pos / div))
    pe = pe.at[:, 1::2].set(jnp.cos(pos / div))
    return pe


def reference_encoder(src_seq, params):
    d_model = params["emb"].shape[1]
    n_head = params["n_head"]
    B, S = src_seq.shape
    x = params["emb"][src_seq] * math.sqrt(d_model) + params["pe"][:S][None]

    def layer_norm(y, g, b):
        mean = jnp.mean(y, axis=-1, keepdims=True)
        var = jnp.mean(jnp.square(y - mean), axis=-1, keepdims=True)
        return (y - mean) / jnp.sqrt(var + 1e-6) * g + b

    for layer in params["layers"]:
        residual = x
        q = (x @ layer["wq"]).reshape(B, S, n_head, d_model).transpose(0, 2, 1, 3)
        k = (x @ layer["wk"]).reshape(B, S, n_head, d_model).transpose(0, 2, 1, 3)
        v = (x @ layer["wv"]).reshape(B, S, n_head, d_model).transpose(0, 2, 1, 3)
        s = jnp.einsum("bhqd,bhkd->bhqk", q * (1.0 / math.sqrt(d_model)), k)
        p = jax.nn.softmax(s, axis=-1)
        o = jnp.einsum("bhqk,bhkd->bhqd", p, v)
        o = o.transpose(0, 2, 1, 3).reshape(B, S, n_head * d_model)
        x = layer_norm(o @ layer["wo"] + residual, layer["ln1_g"], layer["ln1_b"])

        residual = x
        h = jnp.maximum(x @ layer["w1"] + layer["b1"], 0.0)
        y = h @ layer["w2"] + layer["b2"]
        x = layer_norm(y + residual, layer["ln2_g"], layer["ln2_b"])
    return x


# ---------------------------------------------------------------------------
# demo
# ---------------------------------------------------------------------------
if __name__ == "__main__":
    B, S = 2, 16
    d_model, d_inner, n_head = 128, 256, 2
    d_k = d_v = d_model                 # required by the reference module's fc2/fc3 wiring
    vocab, n_layers, max_len = 64, 2, 64

    key = jax.random.PRNGKey(0)
    key, k_emb, k_ids = jax.random.split(key, 3)
    emb = jax.random.normal(k_emb, (vocab, d_model), jnp.float32) * 0.1
    src_seq = jax.random.randint(k_ids, (B, S), 0, vocab, dtype=jnp.int32)

    layers = []
    for _ in range(n_layers):
        key, *ks = jax.random.split(key, 9)
        layers.append(dict(
            wq=jax.random.normal(ks[0], (d_model, n_head * d_model), jnp.float32) * 0.05,
            wk=jax.random.normal(ks[1], (d_model, n_head * d_k), jnp.float32) * 0.05,
            wv=jax.random.normal(ks[2], (d_model, n_head * d_v), jnp.float32) * 0.05,
            wo=jax.random.normal(ks[3], (n_head * d_v, d_model), jnp.float32) * 0.05,
            ln1_g=jnp.ones((d_model,), jnp.float32),
            ln1_b=jnp.zeros((d_model,), jnp.float32),
            w1=jax.random.normal(ks[4], (d_model, d_inner), jnp.float32) * 0.05,
            b1=jax.random.normal(ks[5], (d_inner,), jnp.float32) * 0.05,
            w2=jax.random.normal(ks[6], (d_inner, d_model), jnp.float32) * 0.05,
            b2=jax.random.normal(ks[7], (d_model,), jnp.float32) * 0.05,
            ln2_g=jnp.ones((d_model,), jnp.float32),
            ln2_b=jnp.zeros((d_model,), jnp.float32),
        ))

    params = dict(emb=emb, pe=sinusoidal_pe(max_len, d_model), n_head=n_head, layers=layers)
    ref = reference_encoder(src_seq, params)

    # f32 run (tight check).  Small q/col/inner tiles deliberately exercise the q-tiling and
    # the QKV / FFN weight-streaming grid axes.
    out_f32 = encoder_forward(src_seq, prepare_params(params, jnp.float32),
                              row_tile=512, q_tile=8, qkv_col_tile=256, ffn_inner_tile=128)
    out_f32 = jax.block_until_ready(out_f32)
    assert out_f32.shape == (B, S, d_model)
    assert jnp.allclose(out_f32, ref, atol=1e-2, rtol=1e-2), "f32 mismatch vs reference"

    # bf16 run: native-dtype MXU inputs with f32 accumulation (~2x MXU throughput and half the
    # weight VMEM / DMA bytes on v5e/v6e/v7x); compared loosely against the f32 reference.
    out_bf16 = encoder_forward(src_seq, prepare_params(params, jnp.bfloat16),
                               row_tile=512, qkv_col_tile=256, ffn_inner_tile=128)
    out_bf16 = jax.block_until_ready(out_bf16)
    assert out_bf16.shape == (B, S, d_model)
    assert jnp.allclose(out_bf16.astype(jnp.float32), ref, atol=1e-1, rtol=1e-1), \
        "bf16 drifted too far from the f32 reference"

    print("KERNEL_OK")
</pallas_src>

<mosaic_0001>
module attributes {stable_mosaic.version = 11 : i64} {
  func.func @_embed_pe_kernel(%arg0: i32, %arg1: memref<16x128xf32, #tpu.memory_space<vmem>>, %arg2: memref<16x128xf32, #tpu.memory_space<vmem>>, %arg3: memref<16x128xf32, #tpu.memory_space<vmem>>) attributes {dimension_semantics = [#tpu.dimension_semantics<parallel>], iteration_bounds = array<i64: 2>, scalar_prefetch = 0 : i64, scratch_operands = 0 : i64, tpu.core_type = #tpu.core_type<tc>, window_params = [{transform_indices = @transform_0, window_bounds = array<i64: 16, 128>}, {transform_indices = @transform_1, window_bounds = array<i64: 16, 128>}, {transform_indices = @transform_2, window_bounds = array<i64: 16, 128>}]} {
    %c0 = arith.constant 0 : index
    %c0_0 = arith.constant 0 : index
    %0 = vector.load %arg1[%c0, %c0_0] : memref<16x128xf32, #tpu.memory_space<vmem>>, vector<16x128xf32>
    %cst = arith.constant 11.3137083 : f32
    %1 = vector.broadcast %cst : f32 to vector<16x128xf32>
    %2 = arith.mulf %0, %1 : vector<16x128xf32>
    %c0_1 = arith.constant 0 : index
    %c0_2 = arith.constant 0 : index
    %3 = vector.load %arg2[%c0_1, %c0_2] : memref<16x128xf32, #tpu.memory_space<vmem>>, vector<16x128xf32>
    %4 = arith.addf %2, %3 : vector<16x128xf32>
    %c0_3 = arith.constant 0 : index
    %c0_4 = arith.constant 0 : index
    %5 = vector.load %arg3[%c0_3, %c0_4] : memref<16x128xf32, #tpu.memory_space<vmem>>, vector<16x128xf32>
    tpu.vector_store %arg3[%c0_3, %c0_4], %4 {strides = array<i32>} : memref<16x128xf32, #tpu.memory_space<vmem>>, vector<16x128xf32>,
    return
  }
  func.func @transform_0(%arg0: i32) -> (i32, i32) {
    %c0_i32 = arith.constant 0 : i32
    %c0_i32_0 = arith.constant 0 : i32
    return %arg0, %c0_i32 : i32, i32
  }
  func.func @transform_1(%arg0: i32) -> (i32, i32) {
    %c0_i32 = arith.constant 0 : i32
    %c0_i32_0 = arith.constant 0 : i32
    %c0_i32_1 = arith.constant 0 : i32
    return %c0_i32, %c0_i32_0 : i32, i32
  }
  func.func @transform_2(%arg0: i32) -> (i32, i32) {
    %c0_i32 = arith.constant 0 : i32
    %c0_i32_0 = arith.constant 0 : i32
    return %arg0, %c0_i32 : i32, i32
  }
}

</mosaic_0001>

<bundles_post_ra>
// kernel: tpu_custom_call.1
= control target key start
LH: loop header
LB: loop body
LE: loop exit
PB: predicated region body
PF: predicated region fallthrough
CT: control target
= control target key end

     0   :  { %7 = vsyncpa [#allocation3], 0  ;;  %s729_s0 = inlined_call_operand.hbm [shape: f32[32,128], index: 0, kind: input, shape index: {}]   ;;  %s730_s1 = inlined_call_operand.hbm [shape: f32[64,128], index: 1, kind: input, shape index: {}]   ;;  %s731_s2 = inlined_call_operand.hbm [shape: f32[32,128], index: 2, kind: output, shape index: {}]  }
   0x1   :  { %9 = vsyncpa [#allocation3 + $0x1], 0 }
   0x2   :  { %10 = vsyncpa [#allocation6], 0 }
   0x3   :  { %11 = vsyncpa [#allocation4], 0 }
   0x4   :  { %13 = vsyncpa [#allocation4 + $0x1], 0  ;;  %s517_s9 = smov 0   ;;  %s519_s10 = smov 0  }
   0x5   :  { %s521_s11 = smov 0   ;;  %s523_s12 = smov 0  }
   0x6 LB: > { %s538_s13 = sadd.s32 4294967295, %s493_s12   ;;  %s286_s14 = sadd.s32 4294967294, %s493_s12   ;;  %s493_s12 = sphi %s523_s12, %s751_s12   ;;  %s489_s11 = sphi %s521_s11, %s750_s11   ;;  %s485_s10 = sphi %s519_s10, %s749_s10   ;;  %s481_s9 = sphi %s517_s9, %s748_s9  }
   0x7   : > { %p39_p0 = scmp.ne.s32.totalorder %s485_s10, %s481_s9  ;;  %p732_p1 = scmp.eq.s32.totalorder %s538_s13, 0 }
   0x8   : > { %p90_p3 = scmp.eq.s32.totalorder %s286_s14, 1  ;;  %p287_p5 = scmp.ge.s32.totalorder %s493_s12, 1 }
   0x9   : > { %p547_p4 = por %p732_p1, %p39_p0  ;;  %p97_p7 = scmp.lt.s32.totalorder %s493_s12, 3 }
   0xa   : > { %p552_p6 = por %p90_p3, %p39_p0  ;;  %s495_s18 = smov [#allocation5]  }
   0xb   : > { %s735_s15 = scalar_select %p547_p4, 1, 0 }
   0xc   : > { %s736_s16 = scalar_select %p552_p6, 1, 0 }
   0xd   : > { %p557_p8 = pnand %p287_p5, %p97_p7  ;;  %s109_s19 = sshll.u32 %s495_s18, 4  ;;  %s561_s19 = int_to_ptr.vmem [resolvable:$true] %s109_s19 }
   0xe   : > { %s573_s21 = sadd.s32 1, %s493_s12   ;;  %s26_s22 = sadd.s32 1, %s489_s11 }
   0xf   : > { %s737_s17 = scalar_select %p557_p8, 1, 0 }
  0x10   : > { %p312_p9 = pneg %p557_p8  ;;  %s23_s23 = ssub.s32 %s493_s12, %s573_s21 }
  0x11   : > { %s365_s26 = scalar_lea.hbm %s730_s1, 256  ;;  %s370_s3 = scalar_lea.hbm %s730_s1, 1024 }
  0x12   : > { %p568_p11 = pnand %p312_p9, %p732_p1  ;;  %p366_p12 = scmp.ne.s32.totalorder %s730_s1, %s365_s26 }
  0x13   : > { %p371_p5 = scmp.lt.u32.totalorder %s370_s3, %s365_s26  ;;  %p372_p7 = scmp.lt.u32.totalorder %s365_s26, %s730_s1 }
  0x14   : > { %p367_p13 = pneg %p568_p11 }
  0x15   : > { %p373_p9 = por %p372_p7, %p371_p5 }
  0x16   : > { %p368_p0 = pnand %p367_p13, %p366_p12 }
  0x18   : > { %p369_p3 = pneg %p368_p0 }
  0x1a   : > { %p374_p10 = pnand %p373_p9, %p369_p3 }
  0x1c   : > { %377 = shalt.err (!%p374_p10)
}
  0x1d   : > { %s378_s6 = scalar_lea.vmem %s561_s19, 256  ;;  %p386_p0 = scmp.lt.s32.totalorder %s561_s19, %s561_s19 }
  0x1e   : > { %p379_p1 = scmp.ne.s32.totalorder %s561_s19, %s378_s6  ;;  %p387_p6 = scmp.lt.s32.totalorder %s378_s6, %s378_s6 }
  0x20   : > { %p381_p2 = pnand %p379_p1, %p367_p13  ;;  %p388_p4 = por %p387_p6, %p386_p0 }
  0x22   : > { %p382_p12 = pneg %p381_p2 }
  0x24   : > { %p389_p8 = pnand %p388_p4, %p382_p12 }
  0x26   : > { %392 = shalt.err (!%p389_p8)
}
  0x27   : > { %s496_s7 = smov 128   ;;  %s497_s8 = smov 8  }
  0x28   : > { %315 = dma.hbm_to_vmem [thread:$0]  (!%p568_p11), %s730_s1, 256, %s561_s19, [#allocation6], %s496_s7, %s496_s7, %s497_s8  }
  0x29   : > { %p24_p1 = scmp.eq.s32.totalorder %s23_s23, 0  ;;  %p33_p2 = scmp.ne.s32.totalorder %s489_s11, %s485_s10 }
  0x2a   : > { %p34_p4 = scmp.eq.s32.totalorder %s493_s12, 0  ;;  %p325_p6 = scmp.lt.s32.totalorder %s493_s12, 2 }
  0x2b   : > { %s612_s24 = scalar_select %p24_p1, %s489_s11, %s26_s22  }
  0x2c   : > { %p35_p8 = por %p34_p4, %p33_p2  ;;  %p739_p10 = scmp.eq.s32.totalorder %s538_s13, 1 }
  0x2d   : > { %s123_s20 = sand.u32 1, %s489_s11   ;;  %s302_s26 = sshll.u32 %s493_s12, 8 }
  0x2e   : > { %p616_p13 = por %p739_p10, %p33_p2  ;;  %s290_s27 = sshll.u32 %s123_s20, 4 }
  0x2f   : > { %s625_s19 = scalar_lea.hbm %s729_s0, %s302_s26  ;;  %s127_s22 = scalar_lea.vmem [#allocation2], %s290_s27 }
  0x30   : > { %s134_s23 = sshll.u32 %s127_s22, 4  ;;  %p627_p11 = pnand %p325_p6, %p35_p8  ;;  %s631_s23 = int_to_ptr.vmem [resolvable:$true] %s134_s23 }
  0x31   : > { %s633_s3 = scalar_lea.sflag [#allocation3], %s123_s20  ;;  %s393_s4 = scalar_lea.hbm %s625_s19, 256 }
  0x32   : > { %p394_p3 = scmp.ne.s32.totalorder %s625_s19, %s393_s4  ;;  %p395_p5 = pneg %p627_p11 }
  0x33   : > { %s398_s14 = scalar_lea.hbm %s729_s0, 512  ;;  %p399_p12 = scmp.lt.u32.totalorder %s625_s19, %s729_s0 }
  0x34   : > { %p396_p7 = pnand %p395_p5, %p394_p3  ;;  %p400_p0 = scmp.lt.u32.totalorder %s398_s14, %s393_s4 }
  0x35   : > { %p402_p2 = scmp.lt.u32.totalorder %s393_s4, %s625_s19 }
  0x36   : > { %p397_p9 = pneg %p396_p7  ;;  %p401_p1 = por %p400_p0, %p399_p12 }
  0x38   : > { %p403_p4 = por %p402_p2, %p401_p1 }
  0x3a   : > { %p404_p6 = pnand %p403_p4, %p397_p9 }
  0x3c   : > { %407 = shalt.err (!%p404_p6)
}
  0x3d   : > { %s408_s20 = scalar_lea.vmem %s631_s23, 256  ;;  %s498_s27 = smov [#allocation2]  }
  0x3e   : > { %p409_p8 = scmp.ne.s32.totalorder %s631_s23, %s408_s20  ;;  %s413_s28 = sshll.u32 %s498_s27, 4  ;;  %s414_s28 = int_to_ptr.vmem [resolvable:$false] %s413_s28 }
  0x3f   : > { %s415_s29 = scalar_lea.vmem %s414_s28, 512  ;;  %p416_p7 = scmp.lt.s32.totalorder %s631_s23, %s414_s28 }
  0x40   : > { %p411_p10 = pnand %p409_p8, %p395_p5  ;;  %p417_p12 = scmp.lt.s32.totalorder %s415_s29, %s408_s20 }
  0x42   : > { %p412_p3 = pneg %p411_p10  ;;  %p418_p0 = por %p417_p12, %p416_p7 }
  0x44   : > { %p419_p1 = pnand %p418_p0, %p412_p3 }
  0x46   : > { %422 = shalt.err (!%p419_p1)
}
  0x47   : > { %319 = dma.hbm_to_vmem [thread:$0]  (!%p627_p11), %s625_s19, 256, %s631_s23, %s633_s3, %s496_s7, %s496_s7, %s497_s8  }
  0x48   : > { %p742_p5 = scmp.ne.s32.totalorder %s737_s17, 0 }
  0x49   : > { %s667_s22 = sand.u32 (!%p742_p5), 1, %s485_s10   ;;  %p743_p9 = scmp.ne.s32.totalorder (!%p742_p5), %s735_s15, 0 }
  0x4a   : > { %146 = sbr.rel (%p742_p5) target bundleno = 111 (0x6f), region = 28  ;;  %s294_s4 = sshll.u32 (!%p742_p5), %s667_s22, 4 }
  0x4b   : > { %s149_s5 = scalar_lea.sflag (!%p742_p5), [#allocation3], %s667_s22  ;;  %s152_s6 = scalar_lea.vmem (!%p742_p5), [#allocation2], %s294_s4 }
  0x51   : > { %468 = dma.done.wait (%p743_p9), %s149_s5, 256  }
  0x52   : > { %470 = vsyncadd (%p743_p9), %s149_s5, 4294967040  ;;  %p744_p2 = scmp.eq.s32.totalorder %s538_s13, 0 }
  0x54   : > { %472 = dma.done.wait (%p744_p2), [#allocation6], 256   ;;  %p745_p11 = pmov %p744_p2 }
  0x55   : > { %s176_s17 = scalar_lea.vmem [#allocation7], %s294_s4  ;;  %s303_s8 = sshll.u32 %s538_s13, 8  ;;  %v179_v0 = vld [vmem:[%s152_s6] sm:$0xff]  ;;  %v180_v2 = vld [vmem:[%s152_s6 + $0x8] sm:$0xff] }
  0x56   : > { %474 = vsyncadd (%p745_p11), [#allocation6], 4294967040  ;;  %s203_s7 = sshll.u32 %s176_s17, 4  ;;  %v183_v1 = vld [vmem:[#allocation5] sm:$0xff]  ;;  %v181_v3 = vmul.f32 11.313708, %v179_v0  ;;  %s685_s23 = scalar_lea.hbm %s731_s2, %s303_s8  ;;  %s680_s7 = int_to_ptr.vmem [resolvable:$true] %s203_s7 }
  0x57   : > { %v182_v4 = vmul.f32 11.313708, %v180_v2  ;;  %v184_v5 = vld [vmem:[#allocation5 + $0x8] sm:$0xff]  ;;  %s190_s13 = scalar_lea.sflag [#allocation4], %s667_s22  ;;  %s423_s30 = scalar_lea.vmem %s680_s7, 256 }
  0x58   : > { %v185_v6 = vadd.f32 %v183_v1, %v181_v3  ;;  %p424_p4 = scmp.ne.s32.totalorder %s680_s7, %s423_s30  ;;  %s499_s3 = smov [#allocation7]  }
  0x59   : > { %v186_v7 = vadd.f32 %v184_v5, %v182_v4  ;;  %s427_s14 = sshll.u32 %s499_s3, 4  ;;  %s428_s14 = int_to_ptr.vmem [resolvable:$false] %s427_s14 }
  0x5a   : > { %187 = vst [vmem:[%s176_s17] sm:$0xff] %v185_v6  ;;  %p425_p6 = pnand %p424_p4, %p616_p13  ;;  %s429_s18 = scalar_lea.vmem %s428_s14, 512 }
  0x5b   : > { %188 = vst [vmem:[%s176_s17 + $0x8] sm:$0xff] %v186_v7  ;;  %p430_p10 = scmp.lt.s32.totalorder %s680_s7, %s428_s14  ;;  %p431_p3 = scmp.lt.s32.totalorder %s429_s18, %s423_s30 }
  0x5c   : > { %p426_p8 = pneg %p425_p6 }
  0x5d   : > { %p432_p7 = por %p431_p3, %p430_p10 }
  0x5f   : > { %p433_p12 = pnand %p432_p7, %p426_p8 }
  0x61   : > { %436 = shalt.err (!%p433_p12)
}
  0x62   : > { %s437_s26 = scalar_lea.hbm %s685_s23, 256  ;;  %s441_s28 = scalar_lea.hbm %s731_s2, 512 }
  0x63   : > { %p438_p0 = scmp.ne.s32.totalorder %s685_s23, %s437_s26  ;;  %p442_p9 = scmp.lt.u32.totalorder %s685_s23, %s731_s2 }
  0x64   : > { %p443_p2 = scmp.lt.u32.totalorder %s441_s28, %s437_s26  ;;  %p445_p4 = scmp.lt.u32.totalorder %s437_s26, %s685_s23 }
  0x65   : > { %p439_p1 = pnand %p438_p0, %p616_p13 }
  0x66   : > { %p444_p11 = por %p443_p2, %p442_p9 }
  0x67   : > { %p440_p5 = pneg %p439_p1 }
  0x68   : > { %p446_p6 = por %p445_p4, %p444_p11 }
  0x6a   : > { %p447_p8 = pnand %p446_p6, %p440_p5 }
  0x6c   : > { %450 = shalt.err (!%p447_p8)
}
  0x6d   : > { %s500_s5 = smov 128   ;;  %s501_s6 = smov 8  }
  0x6e   : > { %310 = dma.vmem_to_hbm [thread:$0]  (%p616_p13), %s680_s7, 256, %s685_s23, %s190_s13, %s500_s5, %s500_s5, %s501_s6  }
  0x6f PF: > { %s218_s17 = sand.u32 1, %s481_s9   ;;  %p746_p10 = scmp.ne.s32.totalorder %s736_s16, 0 }
  0x70   : > { %p747_p3 = scmp.ge.s32.totalorder %s493_s12, 2  ;;  %s219_s8 = scalar_lea.sflag [#allocation4], %s218_s17 }
  0x72   : > { %p321_p7 = pnand %p747_p3, %p746_p10 }
  0x74   : > { %476 = dma.done.wait (!%p321_p7), %s219_s8, 256  }
  0x75   : > { %478 = vsyncadd (!%p321_p7), %s219_s8, 4294967040  ;;  %p16_p12 = scmp.ge.s32.totalorder %s573_s21, 4   ;;  %s748_s9 = smov %s485_s10 }
  0x76   : > { %s749_s10 = smov %s489_s11  ;;  %s750_s11 = smov %s612_s24 }
  0x77   : > { %s751_s12 = smov %s573_s21  ;;  %18 = sbr.rel (!%p16_p12) target bundleno = 6 (0x6), region = 77 }
  0x7e   :  { %224 = vsyncpa [#allocation3], 1 }
  0x7f   :  { %226 = vsyncpa [#allocation3 + $0x1], 1 }
  0x80   :  { %227 = vsyncpa [#allocation6], 1 }
  0x81   :  { %228 = vsyncpa [#allocation4], 1 }
  0x82   :  { %230 = vsyncpa [#allocation4 + $0x1], 1 }

</bundles_post_ra>
